<compile_context>
chip_gen: v7x
topology: tpu7x:2x2x1
jax: 0.10.0
libtpu: 0.0.40
codegen_flags: <defaults>
</compile_context>

<pallas_src>
import functools

import jax
import jax.numpy as jnp
from jax.experimental import pallas as pl
from jax.experimental.pallas import tpu as pltpu


def _round_up(n, k):
    return ((n + k - 1) // k) * k


def _lqr_ode_kernel(
    t_ref,            # SMEM (1, 1)  f32 scalar time
    x_ref,            # VMEM (Bt, d)
    w1t_ref,          # VMEM (1, h1)  -- first row of W1 (the "t" column)
    w1x_ref,          # VMEM (d, h1)  -- remaining rows of W1 (the "x" columns)
    b1_ref,           # VMEM (1, h1)
    w2_ref,           # VMEM (h1, h2)
    b2_ref,           # VMEM (1, h2)
    w3m_ref,          # VMEM (h2, d)  -- w3 @ M^T (output layer folded into M)
    b3m_ref,          # VMEM (1, d)   -- b3 @ M^T
    hT_ref,           # VMEM (d, d)   -- H^T
    out_ref,          # VMEM (Bt, d)
):
    t = t_ref[0, 0]
    x = x_ref[...]

    # layer 1: relu( [t*1, x] @ W1 + b1 ) == relu( t*W1_row0 + x @ W1_rest + b1 )
    h = (t * w1t_ref[...]
         + jnp.dot(x, w1x_ref[...], preferred_element_type=jnp.float32)
         + b1_ref[...])
    h = jnp.maximum(h, 0.0)

    # layer 2
    h = jnp.dot(h, w2_ref[...], preferred_element_type=jnp.float32) + b2_ref[...]
    h = jnp.maximum(h, 0.0)

    # dX = x @ H^T + alpha @ M^T, with the output layer folded:
    #   alpha @ M^T = (h @ w3 + b3) @ M^T = h @ (w3 @ M^T) + b3 @ M^T
    out_ref[...] = (
        jnp.dot(x, hT_ref[...], preferred_element_type=jnp.float32)
        + jnp.dot(h, w3m_ref[...], preferred_element_type=jnp.float32)
        + b3m_ref[...]
    )


@functools.partial(jax.jit, static_argnames=("batch_tile",))
def func_ode_lqr(t, x, params, *, batch_tile=512):
    """t: python/jnp scalar, x: (B, d) f32. Returns (B, d) f32."""
    B, d = x.shape
    w1, b1, w2, b2, w3, b3, H, M = (
        params["w1"], params["b1"], params["w2"], params["b2"],
        params["w3"], params["b3"], params["H"], params["M"],
    )
    h1 = w1.shape[1]
    h2 = w2.shape[1]
    m = w3.shape[1]

    # --- glue (plain JAX, constants across ODE calls; not on the hot path) ---
    t_arr = jnp.asarray(t, jnp.float32).reshape(1, 1)
    w1t = w1[0:1, :]                         # (1, h1)
    w1x = w1[1:, :]                          # (d, h1)
    b1r = b1.reshape(1, h1)
    b2r = b2.reshape(1, h2)
    hT = H.T                                 # (d, d)
    w3m = w3 @ M.T                           # (h2, d)  fold output layer into M
    b3m = b3.reshape(1, m) @ M.T             # (1, d)

    # --- batch tiling (grid over batch, weights resident across steps) ---
    bt = min(batch_tile, _round_up(B, 8))    # sublane-aligned tile
    Bp = _round_up(B, bt)
    x_in = jnp.pad(x, ((0, Bp - B), (0, 0))) if Bp != B else x
    grid = (Bp // bt,)

    def _const(i):
        return (0, 0)

    smem_spec = pl.BlockSpec((1, 1), _const, memory_space=pltpu.MemorySpace.SMEM)

    def wspec(shape):
        # full-array block, constant index -> DMA'd once, pinned in VMEM
        return pl.BlockSpec(shape, _const)

    flops = 2 * Bp * (d * h1 + h1 * h2 + h2 * d + d * d)
    bytes_accessed = 4 * (
        Bp * d * 2                                # x in + out
        + (d + 1) * h1 + h1 * h2 + h2 * d + d * d  # weights
        + h1 + h2 + d + 1                          # biases + t
    )

    out = pl.pallas_call(
        _lqr_ode_kernel,
        out_shape=jax.ShapeDtypeStruct((Bp, d), jnp.float32),
        grid=grid,
        in_specs=[
            smem_spec,
            pl.BlockSpec((bt, d), lambda i: (i, 0)),   # x tile
            wspec((1, h1)),
            wspec((d, h1)),
            wspec((1, h1)),
            wspec((h1, h2)),
            wspec((1, h2)),
            wspec((h2, d)),
            wspec((1, d)),
            wspec((d, d)),
        ],
        out_specs=pl.BlockSpec((bt, d), lambda i: (i, 0)),
        compiler_params=pltpu.CompilerParams(
            dimension_semantics=("parallel",),          # megacore split on v7x
            vmem_limit_bytes=32 * 1024 * 1024,          # safe on v5e/v6e/v7x
        ),
        cost_estimate=pl.CostEstimate(
            flops=flops, transcendentals=0, bytes_accessed=bytes_accessed),
    )(t_arr, x_in, w1t, w1x, b1r, w2, b2r, w3m, b3m, hT)

    return out[:B] if Bp != B else out


def _ref_forward(t, x, params):
    """Pure-JAX reference mirroring the PyTorch forward."""
    ones = jnp.ones((x.shape[0], 1), x.dtype)
    input_nn = jnp.concatenate([ones * t, x], axis=1)
    h = jax.nn.relu(input_nn @ params["w1"] + params["b1"])
    h = jax.nn.relu(h @ params["w2"] + params["b2"])
    alpha = h @ params["w3"] + params["b3"]
    out = (params["H"] @ x[:, :, None] + params["M"] @ alpha[:, :, None])
    return out[:, :, 0]


if __name__ == "__main__":
    # Small, deterministic problem sizes implied by the module:
    #   state dim d = input_dim, control dim m = output_dim.
    B, d, m = 8, 4, 3
    h1, h2 = 32, 32

    key = jax.random.PRNGKey(0)
    ks = jax.random.split(key, 10)

    params = {
        "w1": jax.random.normal(ks[0], (d + 1, h1), jnp.float32) * 0.2,
        "b1": jax.random.normal(ks[1], (h1,), jnp.float32) * 0.1,
        "w2": jax.random.normal(ks[2], (h1, h2), jnp.float32) * 0.2,
        "b2": jax.random.normal(ks[3], (h2,), jnp.float32) * 0.1,
        "w3": jax.random.normal(ks[4], (h2, m), jnp.float32) * 0.2,
        "b3": jax.random.normal(ks[5], (m,), jnp.float32) * 0.1,
        "H":  jax.random.normal(ks[6], (d, d), jnp.float32) * 0.5,
        "M":  jax.random.normal(ks[7], (d, m), jnp.float32) * 0.5,
    }

    x = jax.random.normal(ks[8], (B, d), jnp.float32)
    t = 0.37

    out = func_ode_lqr(t, x, params)
    out = jax.block_until_ready(out)

    ref = _ref_forward(jnp.float32(t), x, params)
    assert out.shape == (B, d)
    assert jnp.allclose(out, ref, atol=1e-5, rtol=1e-5), (out, ref)

    # Also exercise a non-tile-multiple batch to cover the padding path.
    x2 = jax.random.normal(ks[9], (13, d), jnp.float32)
    out2 = jax.block_until_ready(func_ode_lqr(t, x2, params))
    ref2 = _ref_forward(jnp.float32(t), x2, params)
    assert out2.shape == (13, d)
    assert jnp.allclose(out2, ref2, atol=1e-5, rtol=1e-5), (out2, ref2)

    print("KERNEL_OK")
</pallas_src>

<mosaic_0001>
module attributes {stable_mosaic.version = 11 : i64} {
  func.func @_lqr_ode_kernel(%arg0: i32, %arg1: memref<1x1xf32, #tpu.memory_space<smem>>, %arg2: memref<8x4xf32, #tpu.memory_space<vmem>>, %arg3: memref<1x32xf32, #tpu.memory_space<vmem>>, %arg4: memref<4x32xf32, #tpu.memory_space<vmem>>, %arg5: memref<1x32xf32, #tpu.memory_space<vmem>>, %arg6: memref<32x32xf32, #tpu.memory_space<vmem>>, %arg7: memref<1x32xf32, #tpu.memory_space<vmem>>, %arg8: memref<32x4xf32, #tpu.memory_space<vmem>>, %arg9: memref<1x4xf32, #tpu.memory_space<vmem>>, %arg10: memref<4x4xf32, #tpu.memory_space<vmem>>, %arg11: memref<8x4xf32, #tpu.memory_space<vmem>>) attributes {dimension_semantics = [#tpu.dimension_semantics<parallel>], iteration_bounds = array<i64: 1>, scalar_prefetch = 0 : i64, scratch_operands = 0 : i64, tpu.core_type = #tpu.core_type<tc>, window_params = [{transform_indices = @transform_0, window_bounds = array<i64: 1, 1>}, {transform_indices = @transform_1, window_bounds = array<i64: 8, 4>}, {pipeline_mode = #tpu.pipeline_mode<synchronous>, transform_indices = @transform_2, window_bounds = array<i64: 1, 32>}, {pipeline_mode = #tpu.pipeline_mode<synchronous>, transform_indices = @transform_3, window_bounds = array<i64: 4, 32>}, {pipeline_mode = #tpu.pipeline_mode<synchronous>, transform_indices = @transform_4, window_bounds = array<i64: 1, 32>}, {pipeline_mode = #tpu.pipeline_mode<synchronous>, transform_indices = @transform_5, window_bounds = array<i64: 32, 32>}, {pipeline_mode = #tpu.pipeline_mode<synchronous>, transform_indices = @transform_6, window_bounds = array<i64: 1, 32>}, {pipeline_mode = #tpu.pipeline_mode<synchronous>, transform_indices = @transform_7, window_bounds = array<i64: 32, 4>}, {pipeline_mode = #tpu.pipeline_mode<synchronous>, transform_indices = @transform_8, window_bounds = array<i64: 1, 4>}, {pipeline_mode = #tpu.pipeline_mode<synchronous>, transform_indices = @transform_9, window_bounds = array<i64: 4, 4>}, {transform_indices = @transform_10, window_bounds = array<i64: 8, 4>}]} {
    %c0 = arith.constant 0 : index
    %c0_0 = arith.constant 0 : index
    %0 = memref.load %arg1[%c0, %c0_0] : memref<1x1xf32, #tpu.memory_space<smem>>
    %c0_1 = arith.constant 0 : index
    %c0_2 = arith.constant 0 : index
    %1 = vector.load %arg2[%c0_1, %c0_2] : memref<8x4xf32, #tpu.memory_space<vmem>>, vector<8x4xf32>
    %c0_3 = arith.constant 0 : index
    %c0_4 = arith.constant 0 : index
    %2 = vector.load %arg3[%c0_3, %c0_4] : memref<1x32xf32, #tpu.memory_space<vmem>>, vector<1x32xf32>
    %3 = vector.broadcast %0 : f32 to vector<1x32xf32>
    %4 = arith.mulf %3, %2 : vector<1x32xf32>
    %c0_5 = arith.constant 0 : index
    %c0_6 = arith.constant 0 : index
    %5 = vector.load %arg4[%c0_5, %c0_6] : memref<4x32xf32, #tpu.memory_space<vmem>>, vector<4x32xf32>
    %cst = arith.constant dense<0.000000e+00> : vector<8x32xf32>
    %6 = tpu.matmul %1, %5, %cst {dimension_numbers = #tpu.dot_dimension_numbers<[1], [0], [0], [1], [0, 0, 1, 1], [], []>} : vector<8x4xf32>, vector<4x32xf32>, vector<8x32xf32> -> vector<8x32xf32>
    %7 = vector.broadcast %4 : vector<1x32xf32> to vector<8x32xf32>
    %8 = arith.addf %7, %6 : vector<8x32xf32>
    %c0_7 = arith.constant 0 : index
    %c0_8 = arith.constant 0 : index
    %9 = vector.load %arg5[%c0_7, %c0_8] : memref<1x32xf32, #tpu.memory_space<vmem>>, vector<1x32xf32>
    %10 = vector.broadcast %9 : vector<1x32xf32> to vector<8x32xf32>
    %11 = arith.addf %8, %10 : vector<8x32xf32>
    %cst_9 = arith.constant 0.000000e+00 : f32
    %12 = vector.broadcast %cst_9 : f32 to vector<8x32xf32>
    %13 = arith.maximumf %11, %12 : vector<8x32xf32>
    %c0_10 = arith.constant 0 : index
    %c0_11 = arith.constant 0 : index
    %14 = vector.load %arg6[%c0_10, %c0_11] : memref<32x32xf32, #tpu.memory_space<vmem>>, vector<32x32xf32>
    %cst_12 = arith.constant dense<0.000000e+00> : vector<8x32xf32>
    %15 = tpu.matmul %13, %14, %cst_12 {dimension_numbers = #tpu.dot_dimension_numbers<[1], [0], [0], [1], [0, 0, 1, 1], [], []>} : vector<8x32xf32>, vector<32x32xf32>, vector<8x32xf32> -> vector<8x32xf32>
    %c0_13 = arith.constant 0 : index
    %c0_14 = arith.constant 0 : index
    %16 = vector.load %arg7[%c0_13, %c0_14] : memref<1x32xf32, #tpu.memory_space<vmem>>, vector<1x32xf32>
    %17 = vector.broadcast %16 : vector<1x32xf32> to vector<8x32xf32>
    %18 = arith.addf %15, %17 : vector<8x32xf32>
    %cst_15 = arith.constant 0.000000e+00 : f32
    %19 = vector.broadcast %cst_15 : f32 to vector<8x32xf32>
    %20 = arith.maximumf %18, %19 : vector<8x32xf32>
    %c0_16 = arith.constant 0 : index
    %c0_17 = arith.constant 0 : index
    %21 = vector.load %arg10[%c0_16, %c0_17] : memref<4x4xf32, #tpu.memory_space<vmem>>, vector<4x4xf32>
    %cst_18 = arith.constant dense<0.000000e+00> : vector<8x4xf32>
    %22 = tpu.matmul %1, %21, %cst_18 {dimension_numbers = #tpu.dot_dimension_numbers<[1], [0], [0], [1], [0, 0, 1, 1], [], []>} : vector<8x4xf32>, vector<4x4xf32>, vector<8x4xf32> -> vector<8x4xf32>
    %c0_19 = arith.constant 0 : index
    %c0_20 = arith.constant 0 : index
    %23 = vector.load %arg8[%c0_19, %c0_20] : memref<32x4xf32, #tpu.memory_space<vmem>>, vector<32x4xf32>
    %cst_21 = arith.constant dense<0.000000e+00> : vector<8x4xf32>
    %24 = tpu.matmul %20, %23, %cst_21 {dimension_numbers = #tpu.dot_dimension_numbers<[1], [0], [0], [1], [0, 0, 1, 1], [], []>} : vector<8x32xf32>, vector<32x4xf32>, vector<8x4xf32> -> vector<8x4xf32>
    %25 = arith.addf %22, %24 : vector<8x4xf32>
    %c0_22 = arith.constant 0 : index
    %c0_23 = arith.constant 0 : index
    %26 = vector.load %arg9[%c0_22, %c0_23] : memref<1x4xf32, #tpu.memory_space<vmem>>, vector<1x4xf32>
    %27 = vector.broadcast %26 : vector<1x4xf32> to vector<8x4xf32>
    %28 = arith.addf %25, %27 : vector<8x4xf32>
    %c0_24 = arith.constant 0 : index
    %c0_25 = arith.constant 0 : index
    %29 = vector.load %arg11[%c0_24, %c0_25] : memref<8x4xf32, #tpu.memory_space<vmem>>, vector<8x4xf32>
    tpu.vector_store %arg11[%c0_24, %c0_25], %28 {strides = array<i32>} : memref<8x4xf32, #tpu.memory_space<vmem>>, vector<8x4xf32>,
    return
  }
  func.func @transform_0(%arg0: i32) -> (i32, i32) {
    %c0_i32 = arith.constant 0 : i32
    %c0_i32_0 = arith.constant 0 : i32
    %c0_i32_1 = arith.constant 0 : i32
    return %c0_i32, %c0_i32_0 : i32, i32
  }
  func.func @transform_1(%arg0: i32) -> (i32, i32) {
    %c0_i32 = arith.constant 0 : i32
    %c0_i32_0 = arith.constant 0 : i32
    return %arg0, %c0_i32 : i32, i32
  }
  func.func @transform_2(%arg0: i32) -> (i32, i32) {
    %c0_i32 = arith.constant 0 : i32
    %c0_i32_0 = arith.constant 0 : i32
    %c0_i32_1 = arith.constant 0 : i32
    return %c0_i32, %c0_i32_0 : i32, i32
  }
  func.func @transform_3(%arg0: i32) -> (i32, i32) {
    %c0_i32 = arith.constant 0 : i32
    %c0_i32_0 = arith.constant 0 : i32
    %c0_i32_1 = arith.constant 0 : i32
    return %c0_i32, %c0_i32_0 : i32, i32
  }
  func.func @transform_4(%arg0: i32) -> (i32, i32) {
    %c0_i32 = arith.constant 0 : i32
    %c0_i32_0 = arith.constant 0 : i32
    %c0_i32_1 = arith.constant 0 : i32
    return %c0_i32, %c0_i32_0 : i32, i32
  }
  func.func @transform_5(%arg0: i32) -> (i32, i32) {
    %c0_i32 = arith.constant 0 : i32
    %c0_i32_0 = arith.constant 0 : i32
    %c0_i32_1 = arith.constant 0 : i32
    return %c0_i32, %c0_i32_0 : i32, i32
  }
  func.func @transform_6(%arg0: i32) -> (i32, i32) {
    %c0_i32 = arith.constant 0 : i32
    %c0_i32_0 = arith.constant 0 : i32
    %c0_i32_1 = arith.constant 0 : i32
    return %c0_i32, %c0_i32_0 : i32, i32
  }
  func.func @transform_7(%arg0: i32) -> (i32, i32) {
    %c0_i32 = arith.constant 0 : i32
    %c0_i32_0 = arith.constant 0 : i32
    %c0_i32_1 = arith.constant 0 : i32
    return %c0_i32, %c0_i32_0 : i32, i32
  }
  func.func @transform_8(%arg0: i32) -> (i32, i32) {
    %c0_i32 = arith.constant 0 : i32
    %c0_i32_0 = arith.constant 0 : i32
    %c0_i32_1 = arith.constant 0 : i32
    return %c0_i32, %c0_i32_0 : i32, i32
  }
  func.func @transform_9(%arg0: i32) -> (i32, i32) {
    %c0_i32 = arith.constant 0 : i32
    %c0_i32_0 = arith.constant 0 : i32
    %c0_i32_1 = arith.constant 0 : i32
    return %c0_i32, %c0_i32_0 : i32, i32
  }
  func.func @transform_10(%arg0: i32) -> (i32, i32) {
    %c0_i32 = arith.constant 0 : i32
    %c0_i32_0 = arith.constant 0 : i32
    return %arg0, %c0_i32 : i32, i32
  }
}

</mosaic_0001>

<bundles_post_ra>
// kernel: func_ode_lqr.1
= control target key start
LH: loop header
LB: loop body
LE: loop exit
PB: predicated region body
PF: predicated region fallthrough
CT: control target
= control target key end

     0   :  { %vm46_vm0 = vcmask 1043456   ;;  %vm42_vm1 = vcmask 31744   ;;  %v456_v0 = vmov 0.0   ;;  %vm457_vm2 = vmmov 0   ;;  %s576_s3 = inlined_call_operand.vmem [shape: f32[4,32], index: 3, kind: input, shape index: {}]   ;;  %s577_s1 = inlined_call_operand.vmem [shape: f32[8,4], index: 1, kind: input, shape index: {}]   ;;  %s578_s5 = inlined_call_operand.vmem [shape: f32[32,32], index: 5, kind: input, shape index: {}]   ;;  %s579_s7 = inlined_call_operand.vmem [shape: f32[32,4], index: 7, kind: input, shape index: {}]   ;;  %s580_s0 = inlined_call_operand.<no memory space> [shape: f32[1,1], index: 0, kind: input, shape index: {}]   ;;  %s581_s2 = inlined_call_operand.vmem [shape: f32[1,32], index: 2, kind: input, shape index: {}]   ;;  %s582_s4 = inlined_call_operand.vmem [shape: f32[1,32], index: 4, kind: input, shape index: {}]   ;;  %s583_s9 = inlined_call_operand.vmem [shape: f32[4,4], index: 9, kind: input, shape index: {}]   ;;  %s584_s6 = inlined_call_operand.vmem [shape: f32[1,32], index: 6, kind: input, shape index: {}]   ;;  %s585_s8 = inlined_call_operand.vmem [shape: f32[1,4], index: 8, kind: input, shape index: {}]   ;;  %s586_s10 = inlined_call_operand.vmem [shape: f32[8,4], index: 10, kind: output, shape index: {}]  }
   0x1   :  { %409 = vmatprep.subr.mxu0 %v456_v0  ;;  %v41_v1 = vld [vmem:[%s576_s3] sm:$0xf]  ;;  %411 = vmatprep.mubr.msk.f32.mxu0 %vm457_vm2, %v456_v0  ;;  %v458_v3 = vmov 0.0|0.0   ;;  %v137_v5 = vld [vmem:[%s578_s5 + $0x8] sm:$0xff]  ;;  %v138_v7 = vld [vmem:[%s578_s5 + $0x10] sm:$0xff]  ;;  %v121_v13 = vlaneseq  ;;  %v39_v16 = vstv %s580_s0  ;;  %vm147_vm3 = vcmask 261120  }
   0x2   :  { %v37_v2 = vld [vmem:[%s577_s1] sm:$0xff]  ;;  %410 = vmatpush3.msk.msra.mxu0 %vm46_vm0, %v41_v1  ;;  %441 = vmatprep.subr.bf16.mxu1 %v458_v3  ;;  %v139_v8 = vld [vmem:[%s578_s5 + $0x18] sm:$0xff]  ;;  %v224_v11 = vld [vmem:[%s579_s7 + $0x8] sm:$0xff] }
   0x3   :  { %412 = vmatmul.mubr.msk.f32.vlgmr.msra.gmra.mrb[0].mxu0 %vm42_vm1, %v37_v2  ;;  %422 = vmatprep.mubr.msk.f32.mxu1 %vm457_vm2, %v456_v0  ;;  %v136_v4 = vld [vmem:[%s578_s5] sm:$0xff]  ;;  %v445_v9 = vpack.c.bf16 %v139_v8, %v138_v7  ;;  %v122_v14 = vshrl.u32 %v121_v13, 7  ;;  %v225_v26 = vld [vmem:[%s579_s7 + $0x10] sm:$0xff]  ;;  %v226_v27 = vld [vmem:[%s579_s7 + $0x18] sm:$0xff] }
   0x4   :  { %447 = vmatprep.subr.bf16.mxu0 %v458_v3  ;;  %433 = vmatprep.mubr.msk.f32.mxu0 %vm457_vm2, %v456_v0  ;;  %v442_v6 = vpack.c.bf16 %v137_v5, %v136_v4  ;;  %v223_v10 = vld [vmem:[%s579_s7] sm:$0xff]  ;;  %v451_v28 = vpack.c.bf16 %v226_v27, %v225_v26 }
   0x5   :  { %v448_v12 = vpack.c.bf16 %v224_v11, %v223_v10  ;;  %v38_v15 = vld [vmem:[%s581_s2] sm:$0x1]  ;;  %v123_v18 = vsub.s32 0, %v122_v14 }
   0x6   :  { %443 = vmatpush3.bf16.msra.mxu1 %v442_v6  ;;  %v40_v17 = vmul.f32 %v39_v16, %v38_v15  ;;  %v388_v21 = vld [vmem:[%s582_s4] ss:$0 sm:$0xff] }
   0x7   :  { %444 = vmatprep.subr.bf16.mxu1 %v458_v3  ;;  %449 = vmatpush3.bf16.msra.mxu0 %v448_v12  ;;  %v222_v29 = vld [vmem:[%s583_s9] sm:$0xf] }
   0x8   :  { %450 = vmatprep.subr.bf16.mxu0 %v458_v3  ;;  %v124_v19 = vrot.slane %v40_v17, %v123_v18  ;;  %v389_v30 = vld [vmem:[%s584_s6] ss:$0 sm:$0xff] }
   0x9   :  { %v394_v38 = vld [vmem:[%s585_s8] ss:$0 sm:$0xff] }
   0xa   :  { %446 = vmatpush3.bf16.msra.mxu1 %v445_v9 }
   0xb   :  { %436 = vmatprep.subr.mxu1 %v456_v0  ;;  %452 = vmatpush3.bf16.msra.mxu0 %v451_v28 }
  0xd6   :  { %v116_v20 = vpop.f32.mrb[0].mxu0 }
  0xd7   :  { %v126_v22 = vadd.f32 %v124_v19, %v116_v20  ;;  %v413_v23 = vpop.f32.mrb[1].mxu0 }
  0xd9   :  { %v134_v24 = vadd.f32 %v388_v21, %v126_v22 }
  0xdb   :  { %v135_v25 = vmax.f32 %v134_v24, 0.0 }
  0xdd   :  { %423 = vmatmul.mubr.msk.f32.vlgmr.msra.gmra.mrb[0].mxu1 %vm147_vm3, %v135_v25 }
  0xde   :  { %438 = vmatprep.mubr.msk.f32.mxu1 %vm457_vm2, %v456_v0  ;;  %437 = vmatpush3.msk.msra.mxu1 %vm46_vm0, %v222_v29 }
  0xe1   :  { %439 = vmatmul.mubr.msk.f32.vlgmr.msra.gmra.mrb[2].mxu1 %vm42_vm1, %v37_v2 }
 0x1b0   :  { %v217_v31 = vpop.f32.mrb[0].mxu1 }
 0x1b1   :  { %v218_v32 = vadd.f32 %v389_v30, %v217_v31  ;;  %v424_v33 = vpop.f32.mrb[1].mxu1 }
 0x1b3   :  { %v221_v34 = vmax.f32 %v218_v32, 0.0 }
 0x1b4   :  { %v369_v35 = vpop.f32.mrb[2].mxu1 }
 0x1b5   :  { %434 = vmatmul.mubr.msk.f32.vlgmr.msra.gmra.mrb[2].mxu0 %vm147_vm3, %v221_v34  ;;  %v440_v36 = vpop.f32.mrb[3].mxu1 }
 0x288   :  { %v296_v37 = vpop.f32.mrb[2].mxu0 }
 0x289   :  { %v370_v39 = vadd.f32 %v369_v35, %v296_v37  ;;  %v435_v40 = vpop.f32.mrb[3].mxu0 }
 0x28b   :  { %v380_v41 = vadd.f32 %v394_v38, %v370_v39 }
 0x28d   :  { %381 = vst.msk [vmem:[%s586_s10] sm:$0xff] %vm42_vm1, %v380_v41 }

</bundles_post_ra>
